<compile_context>
chip_gen: v5e
topology: v5e:2x2
jax: 0.10.0
libtpu: 0.0.40
codegen_flags: <defaults>
</compile_context>

<pallas_src>
import functools

import jax
import jax.numpy as jnp
from jax.experimental import pallas as pl
from jax.experimental.pallas import tpu as pltpu


# ----------------------------------------------------------------------------
# Stage 1: tiled spatial-sum accumulation -> sums (B, C) in f32
# ----------------------------------------------------------------------------
def _pool_kernel(x_ref, sums_ref, acc_ref, *, hw, hw_tile, ragged):
    h = pl.program_id(2)
    last = pl.num_programs(2) - 1

    @pl.when(h == 0)
    def _():
        acc_ref[...] = jnp.zeros_like(acc_ref)

    if ragged:
        # Last lane-tile hangs past HW: OOB lanes hold unspecified data, so
        # select them to zero *before* the partial reduce (select, not mul,
        # so garbage NaN/Inf cannot propagate).
        lane = jax.lax.broadcasted_iota(jnp.int32, x_ref.shape, 2)
        valid = (h * hw_tile + lane) < hw
        xt = jnp.where(valid, x_ref[...].astype(jnp.float32), 0.0)
    else:
        xt = x_ref[...].astype(jnp.float32)
    acc_ref[...] += jnp.sum(xt, axis=-1)                 # (b_tile, c_tile)

    @pl.when(h == last)
    def _():
        sums_ref[...] = acc_ref[...]


# ----------------------------------------------------------------------------
# Stage 2: tiny MLP (Linear -> ReLU -> Linear -> sigmoid) on pooled means
# ----------------------------------------------------------------------------
def _mlp_kernel(sums_ref, w1_ref, b1_ref, w2_ref, b2_ref, gate_ref, *, inv_hw):
    pooled = sums_ref[...] * inv_hw                      # mean over true H*W
    hid = jnp.dot(pooled, w1_ref[...].astype(jnp.float32),
                  preferred_element_type=jnp.float32) + b1_ref[...].astype(jnp.float32)
    hid = jnp.maximum(hid, 0.0)
    att = jnp.dot(hid, w2_ref[...].astype(jnp.float32),
                  preferred_element_type=jnp.float32) + b2_ref[...].astype(jnp.float32)
    gate_ref[...] = jax.nn.sigmoid(att)                  # (b_mlp, C) f32


# ----------------------------------------------------------------------------
# Stage 3: elementwise rescale x * gate (HBM-roofline load/mul/store stream)
# ----------------------------------------------------------------------------
def _scale_kernel(x_ref, gate_ref, out_ref):
    # gate block is (b_tile, c_tile, 1): broadcasting is a plain lane splat.
    out_ref[...] = x_ref[...] * gate_ref[...].astype(x_ref.dtype)


def _pick_hw_tile(hw, max_lanes):
    """Lane tile: full HW if it fits, else a 128-multiple (exact divisor preferred)."""
    max_lanes = max(128, max_lanes)
    if hw <= max_lanes:
        return hw                                        # block == full dim (always legal)
    if hw % 128 == 0:
        best = 128
        for d in range(128, max_lanes + 1, 128):
            if hw % d == 0:
                best = d
        if best * 4 >= max_lanes:                        # large exact divisor -> no ragged tail
            return best
    return (max_lanes // 128) * 128                      # ragged tail masked in-kernel


def channel_gate(x_nchw, w1, b1, w2, b2):
    """x_nchw: (B, C, H, W), any float dtype. Weights stored (in, out). Returns (B, C, H, W)."""
    B, C, H, W = x_nchw.shape
    HW = H * W
    x3 = x_nchw.reshape(B, C, HW)                        # free reshape, native dtype (no f32 cast)
    itemsize = x3.dtype.itemsize
    x_bytes = B * C * HW * itemsize

    # ---- VMEM budget (generation-aware: 64 MiB on v7x, 128 MiB on v5e/v6e) ---
    try:
        vmem_cap = int(pltpu.get_tpu_info().vmem_capacity_bytes)
    except Exception:
        vmem_cap = 64 << 20                              # conservative fallback
    vmem_budget = int(vmem_cap * 0.70)                   # headroom for Mosaic scratch/sems

    # ---- tile selection ------------------------------------------------------
    b_tile = min(B, 8)                                   # ragged batch handled by OOB-drop
    grid_b = pl.cdiv(B, b_tile)

    # Channel tiling: gives stage 1 a second "parallel" axis (v7x megacore even
    # at small batch) and bounds per-step tile bytes for large-C layers.
    c_tile = 128 if (C % 128 == 0 and C > 128) else C
    grid_c = pl.cdiv(C, c_tile)

    # Lane tile sized so stage-2's double-buffered in+out tiles (+ scratch
    # headroom, ~5 tiles) stay inside the budget; f32 itemsize used to be safe.
    max_lanes = vmem_budget // (5 * b_tile * c_tile * max(itemsize, 4))
    max_lanes = max(128, (max_lanes // 128) * 128)
    hw_tile = _pick_hw_tile(HW, min(1024, max_lanes))
    grid_h = pl.cdiv(HW, hw_tile)
    ragged = (HW % hw_tile) != 0

    # ---- stage 1: tiled spatial sums -> (B, C) f32 ---------------------------
    sums = pl.pallas_call(
        functools.partial(_pool_kernel, hw=HW, hw_tile=hw_tile, ragged=ragged),
        out_shape=jax.ShapeDtypeStruct((B, C), jnp.float32),
        grid_spec=pltpu.PrefetchScalarGridSpec(
            num_scalar_prefetch=0,
            grid=(grid_b, grid_c, grid_h),
            in_specs=[
                pl.BlockSpec((b_tile, c_tile, hw_tile), lambda b, c, h: (b, c, h)),
            ],
            out_specs=pl.BlockSpec((b_tile, c_tile), lambda b, c, h: (b, c)),
            scratch_shapes=[pltpu.VMEM((b_tile, c_tile), jnp.float32)],
        ),
        compiler_params=pltpu.CompilerParams(
            dimension_semantics=("parallel", "parallel", "arbitrary"),
            vmem_limit_bytes=vmem_budget,
        ),
        cost_estimate=pl.CostEstimate(
            flops=B * C * HW, transcendentals=0,
            bytes_accessed=x_bytes + B * C * 4),
    )(x3)

    # ---- stage 2: tiny MLP + sigmoid -> gate (B, C) f32 ----------------------
    Cr = w1.shape[1]
    b_mlp = min(B, 256)
    weight_bytes = sum(int(a.size) * a.dtype.itemsize for a in (w1, b1, w2, b2))
    gate = pl.pallas_call(
        functools.partial(_mlp_kernel, inv_hw=1.0 / HW),
        out_shape=jax.ShapeDtypeStruct((B, C), jnp.float32),
        grid_spec=pltpu.PrefetchScalarGridSpec(
            num_scalar_prefetch=0,
            grid=(pl.cdiv(B, b_mlp),),
            in_specs=[
                pl.BlockSpec((b_mlp, C), lambda i: (i, 0)),
                pl.BlockSpec(w1.shape, lambda i: (0, 0)),
                pl.BlockSpec(b1.shape, lambda i: (0, 0)),
                pl.BlockSpec(w2.shape, lambda i: (0, 0)),
                pl.BlockSpec(b2.shape, lambda i: (0, 0)),
            ],
            out_specs=pl.BlockSpec((b_mlp, C), lambda i: (i, 0)),
        ),
        compiler_params=pltpu.CompilerParams(
            dimension_semantics=("parallel",),
            vmem_limit_bytes=vmem_budget,
        ),
        cost_estimate=pl.CostEstimate(
            flops=4 * B * C * Cr, transcendentals=B * C,
            bytes_accessed=2 * B * C * 4 + weight_bytes),
    )(sums, w1, b1, w2, b2)

    # (B, C) -> (B, C, 1) is layout-preserving (bitcast reshape, no HBM pass);
    # it lets stage 3 load the gate with C on sublanes so the multiply is a
    # lane splat instead of a per-step relayout.
    gate3 = gate.reshape(B, C, 1)

    # ---- stage 3: rescale x by the per-channel gate ---------------------------
    out3 = pl.pallas_call(
        _scale_kernel,
        out_shape=jax.ShapeDtypeStruct((B, C, HW), x3.dtype),
        grid_spec=pltpu.PrefetchScalarGridSpec(
            num_scalar_prefetch=0,
            grid=(grid_b, grid_c, grid_h),
            in_specs=[
                pl.BlockSpec((b_tile, c_tile, hw_tile), lambda b, c, h: (b, c, h)),
                pl.BlockSpec((b_tile, c_tile, 1), lambda b, c, h: (b, c, 0)),
            ],
            out_specs=pl.BlockSpec((b_tile, c_tile, hw_tile), lambda b, c, h: (b, c, h)),
        ),
        compiler_params=pltpu.CompilerParams(
            dimension_semantics=("parallel", "parallel", "parallel"),
            vmem_limit_bytes=vmem_budget,
        ),
        cost_estimate=pl.CostEstimate(
            flops=B * C * HW, transcendentals=0,
            bytes_accessed=2 * x_bytes + B * C * 4),
    )(x3, gate3)

    return out3.reshape(B, C, H, W)


def _reference(x_nchw, w1, b1, w2, b2):
    """Pure-JAX reference of the PyTorch forward (pool_types=['avg'])."""
    pooled = jnp.mean(x_nchw.astype(jnp.float32), axis=(2, 3))   # (B, C)
    h = jnp.maximum(pooled @ w1 + b1, 0.0)
    att = h @ w2 + b2
    scale = jax.nn.sigmoid(att)[:, :, None, None]
    return (x_nchw * scale.astype(x_nchw.dtype)).astype(x_nchw.dtype)


if __name__ == "__main__":
    # Small shapes consistent with the module: reduction_ratio=16 needs
    # gate_channels divisible by 16.
    B, C, H, W = 2, 32, 16, 16
    reduction_ratio = 16
    Cr = C // reduction_ratio  # 2

    key = jax.random.PRNGKey(0)
    kx, k1, k2, k3, k4 = jax.random.split(key, 5)

    x = jax.random.normal(kx, (B, C, H, W), dtype=jnp.float32)

    # Deterministic parameter init mimicking nn.Linear (uniform +-1/sqrt(fan_in)).
    # Weights stored as (in, out) so the kernel does pooled @ w1.
    lim1 = 1.0 / jnp.sqrt(C)
    w1 = jax.random.uniform(k1, (C, Cr), jnp.float32, -lim1, lim1)
    b1 = jax.random.uniform(k2, (1, Cr), jnp.float32, -lim1, lim1)
    lim2 = 1.0 / jnp.sqrt(Cr)
    w2 = jax.random.uniform(k3, (Cr, C), jnp.float32, -lim2, lim2)
    b2 = jax.random.uniform(k4, (1, C), jnp.float32, -lim2, lim2)

    out = channel_gate(x, w1, b1, w2, b2)
    out = jax.block_until_ready(out)

    ref = _reference(x, w1, b1[0], w2, b2[0])
    assert out.shape == x.shape
    assert out.dtype == x.dtype
    assert jnp.allclose(out, ref, atol=1e-5, rtol=1e-5), "mismatch vs reference"

    print("KERNEL_OK")
</pallas_src>

<mosaic_0001>
module attributes {stable_mosaic.version = 11 : i64} {
  func.func @_pool_kernel(%arg0: i32, %arg1: i32, %arg2: i32, %arg3: memref<2x32x256xf32, #tpu.memory_space<vmem>>, %arg4: memref<2x32xf32, #tpu.memory_space<vmem>>, %arg5: memref<2x32xf32, #tpu.memory_space<vmem>>) attributes {dimension_semantics = [#tpu.dimension_semantics<parallel>, #tpu.dimension_semantics<parallel>, #tpu.dimension_semantics<arbitrary>], iteration_bounds = array<i64: 1, 1, 1>, scalar_prefetch = 0 : i64, scratch_operands = 1 : i64, tpu.core_type = #tpu.core_type<tc>, window_params = [{transform_indices = @transform_0, window_bounds = array<i64: 2, 32, 256>}, {transform_indices = @transform_1, window_bounds = array<i64: 2, 32>}]} {
    %c0_i32 = arith.constant 0 : i32
    %0 = arith.cmpi eq, %arg2, %c0_i32 : i32
    %1 = arith.extui %0 : i1 to i32
    %c0_i32_0 = arith.constant 0 : i32
    %2 = arith.cmpi ne, %1, %c0_i32_0 : i32
    scf.if %2 {
      %cst_9 = arith.constant 0.000000e+00 : f32
      %11 = vector.broadcast %cst_9 : f32 to vector<2x32xf32>
      %c0_10 = arith.constant 0 : index
      %c0_11 = arith.constant 0 : index
      %12 = vector.load %arg5[%c0_10, %c0_11] : memref<2x32xf32, #tpu.memory_space<vmem>>, vector<2x32xf32>
      tpu.vector_store %arg5[%c0_10, %c0_11], %11 {strides = array<i32>} : memref<2x32xf32, #tpu.memory_space<vmem>>, vector<2x32xf32>,
    } else {
    }
    %c0 = arith.constant 0 : index
    %c0_1 = arith.constant 0 : index
    %c0_2 = arith.constant 0 : index
    %3 = vector.load %arg3[%c0, %c0_1, %c0_2] : memref<2x32x256xf32, #tpu.memory_space<vmem>>, vector<2x32x256xf32>
    %c0_3 = arith.constant 0 : index
    %c0_4 = arith.constant 0 : index
    %4 = vector.load %arg5[%c0_3, %c0_4] : memref<2x32xf32, #tpu.memory_space<vmem>>, vector<2x32xf32>
    %cst = arith.constant dense<0.000000e+00> : vector<2x32xf32>
    %5 = vector.multi_reduction <add>, %3, %cst [2] : vector<2x32x256xf32> to vector<2x32xf32>
    %6 = arith.addf %4, %5 : vector<2x32xf32>
    %c0_5 = arith.constant 0 : index
    %c0_6 = arith.constant 0 : index
    %7 = vector.load %arg5[%c0_5, %c0_6] : memref<2x32xf32, #tpu.memory_space<vmem>>, vector<2x32xf32>
    tpu.vector_store %arg5[%c0_5, %c0_6], %6 {strides = array<i32>} : memref<2x32xf32, #tpu.memory_space<vmem>>, vector<2x32xf32>,
    %c0_i32_7 = arith.constant 0 : i32
    %8 = arith.cmpi eq, %arg2, %c0_i32_7 : i32
    %9 = arith.extui %8 : i1 to i32
    %c0_i32_8 = arith.constant 0 : i32
    %10 = arith.cmpi ne, %9, %c0_i32_8 : i32
    scf.if %10 {
      %c0_9 = arith.constant 0 : index
      %c0_10 = arith.constant 0 : index
      %11 = vector.load %arg5[%c0_9, %c0_10] : memref<2x32xf32, #tpu.memory_space<vmem>>, vector<2x32xf32>
      %c0_11 = arith.constant 0 : index
      %c0_12 = arith.constant 0 : index
      %12 = vector.load %arg4[%c0_11, %c0_12] : memref<2x32xf32, #tpu.memory_space<vmem>>, vector<2x32xf32>
      tpu.vector_store %arg4[%c0_11, %c0_12], %11 {strides = array<i32>} : memref<2x32xf32, #tpu.memory_space<vmem>>, vector<2x32xf32>,
    } else {
    }
    return
  }
  func.func @transform_0(%arg0: i32, %arg1: i32, %arg2: i32) -> (i32, i32, i32) {
    %c0_i32 = arith.constant 0 : i32
    return %arg0, %arg1, %arg2 : i32, i32, i32
  }
  func.func @transform_1(%arg0: i32, %arg1: i32, %arg2: i32) -> (i32, i32) {
    %c0_i32 = arith.constant 0 : i32
    return %arg0, %arg1 : i32, i32
  }
}

</mosaic_0001>

<bundles_post_ra>
// kernel: tpu_custom_call.1
= control target key start
LH: loop header
LB: loop body
LE: loop exit
PB: predicated region body
PF: predicated region fallthrough
CT: control target
= control target key end

     0   :  { %6 = vsyncpa [#allocation4], 0  ;;  %s211_s0 = inlined_call_operand.hbm [shape: f32[2,32,256], index: 0, kind: input, shape index: {}]   ;;  %s212_s1 = inlined_call_operand.hbm [shape: f32[2,32], index: 1, kind: output, shape index: {}]  }
   0x1   :  { %7 = vsyncpa [#allocation5], 0  ;;  %s12_s8 = sshll.u32 %s211_s0, 4  ;;  %s187_s9 = smov [#allocation3]   ;;  %s13_s8 = int_to_ptr.hbm [resolvable:$true] %s12_s8 }
   0x2   :  { %s14_s10 = sshll.u32 %s187_s9, 4  ;;  %s188_s11 = smov 256   ;;  %s15_s10 = int_to_ptr.vmem [resolvable:$true] %s14_s10 }
   0x3   :  { %s189_s12 = smov 16  }
   0x4   :  { %20 = dma.hbm_to_vmem [thread:$0]  %s13_s8, 2048, %s15_s10, [#allocation4], %s188_s11, %s188_s11, %s189_s12  }
   0x5   :  { %183 = dma.done.wait [#allocation4], 2048  }
   0x6   :  { %184 = vsyncadd [#allocation4], 4294965248  ;;  %v39_v0 = vld [vmem:[#allocation3 + $0x40] sm:$0xff]  ;;  %v40_v1 = vld [vmem:[#allocation3 + $0x48] sm:$0xff]  ;;  %vm29_vm0 = vcmask 254976   ;;  %v190_v24 = vmov 0.0   ;;  %v80_v26 = vlaneseq }
   0x7   :  { %v31_v2 = vld [vmem:[#allocation3] sm:$0xff]  ;;  %v60_v3 = vadd.f32 %v40_v1, %v39_v0  ;;  %v32_v4 = vld [vmem:[#allocation3 + $0x8] sm:$0xff]  ;;  %v41_v9 = vld [vmem:[#allocation3 + $0x50] sm:$0xff]  ;;  %30 = vst.msk [vmem:[#allocation2] sm:$0x3] %vm29_vm0, %v190_v24  ;;  %vm85_vm1 = vcmask 130112  }
   0x8   :  { %v35_v5 = vld [vmem:[#allocation3 + $0x20] sm:$0xff]  ;;  %v36_v6 = vld [vmem:[#allocation3 + $0x28] sm:$0xff]  ;;  %v48_v7 = vadd.f32 %v32_v4, %v31_v2  ;;  %v42_v10 = vld [vmem:[#allocation3 + $0x58] sm:$0xff]  ;;  %v81_v29 = vand.u32 127, %v80_v26  ;;  %vm89_vm2 = vcmask 195712   ;;  %vm93_vm3 = vcmask 261312  }
   0x9   :  { %v54_v8 = vadd.f32 %v36_v6, %v35_v5  ;;  %61 = vadd.xlane.f32.xlu1 %v60_v3  ;;  %v33_v11 = vld [vmem:[#allocation3 + $0x10] sm:$0xff]  ;;  %v34_v12 = vld [vmem:[#allocation3 + $0x18] sm:$0xff]  ;;  %v43_v13 = vld [vmem:[#allocation3 + $0x60] sm:$0xff]  ;;  %v63_v15 = vadd.f32 %v42_v10, %v41_v9  ;;  %vm102_vm4 = vcmask 1041409   ;;  %s191_s0 = smov [#allocation6]   ;;  %s120_s16 = sshll.u32 %s212_s1, 4  ;;  %s121_s16 = int_to_ptr.hbm [resolvable:$true] %s120_s16 }
   0xa   :  { %49 = vadd.xlane.f32.xlu0 %v48_v7  ;;  %v44_v14 = vld [vmem:[#allocation3 + $0x68] sm:$0xff]  ;;  %v51_v16 = vadd.f32 %v34_v12, %v33_v11  ;;  %v45_v18 = vld [vmem:[#allocation3 + $0x70] sm:$0xff]  ;;  %v46_v19 = vld [vmem:[#allocation3 + $0x78] sm:$0xff]  ;;  %v83_v30 = vadd.s32 4294967288, %v81_v29  ;;  %v87_v35 = vadd.s32 4294967280, %v81_v29  ;;  %v91_v38 = vadd.s32 4294967272, %v81_v29 }
   0xb   :  { %55 = vadd.xlane.f32.xlu2 %v54_v8  ;;  %v66_v17 = vadd.f32 %v44_v14, %v43_v13  ;;  %v37_v20 = vld [vmem:[#allocation3 + $0x30] sm:$0xff]  ;;  %v38_v21 = vld [vmem:[#allocation3 + $0x38] sm:$0xff]  ;;  %v69_v22 = vadd.f32 %v46_v19, %v45_v18  ;;  %s118_s13 = sshll.u32 %s191_s0, 4  ;;  %s119_s13 = int_to_ptr.vmem [resolvable:$true] %s118_s13 }
   0xc   :  { %v57_v23 = vadd.f32 %v38_v21, %v37_v20 }
   0xe   :  { %v47_v51 = vld [vmem:[#allocation2] sm:$0x3] }
  0x11   :  { %64 = vadd.xlane.f32.xlu1 %v63_v15 }
  0x12   :  { %52 = vadd.xlane.f32.xlu0 %v51_v16 }
  0x13   :  { %67 = vadd.xlane.f32.xlu2 %v66_v17 }
  0x19   :  { %70 = vadd.xlane.f32.xlu1 %v69_v22 }
  0x1a   :  { %58 = vadd.xlane.f32.xlu0 %v57_v23 }
  0x7c   :  { %v62_v25 = vpop.xlane.xlu1 %61 }
  0x7d   :  { %v50_v27 = vpop.xlane.xlu0 %49  ;;  %v95_v37 = vperm.slane %v62_v25, %v81_v29 }
  0x7e   :  { %v56_v28 = vpop.xlane.xlu2 %55  ;;  %v82_v39 = vperm.slane %v50_v27, %v81_v29 }
  0x7f   :  { %v88_v44 = vperm.slane %v56_v28, %v87_v35 }
  0x84   :  { %v65_v31 = vpop.xlane.xlu1 %64 }
  0x85   :  { %v53_v32 = vpop.xlane.xlu0 %52  ;;  %v96_v33 = vperm.slane %v65_v31, %v83_v30 }
  0x86   :  { %v68_v34 = vpop.xlane.xlu2 %67  ;;  %v84_v36 = vperm.slane %v53_v32, %v83_v30 }
  0x87   :  { %v98_v40 = vperm.slane %v68_v34, %v87_v35  ;;  %v97_v41 = vsel %vm85_vm1, %v96_v33, %v95_v37 }
  0x88   :  { %v86_v42 = vsel %vm85_vm1, %v84_v36, %v82_v39 }
  0x89   :  { %v99_v47 = vsel %vm89_vm2, %v98_v40, %v97_v41  ;;  %v90_v50 = vsel %vm89_vm2, %v88_v44, %v86_v42 }
  0x8c   :  { %v71_v43 = vpop.xlane.xlu1 %70 }
  0x8d   :  { %v100_v45 = vperm.slane %v71_v43, %v91_v38  ;;  %v59_v46 = vpop.xlane.xlu0 %58 }
  0x8e   :  { %v92_v48 = vperm.slane %v59_v46, %v91_v38 }
  0x8f   :  { %v101_v49 = vsel %vm93_vm3, %v100_v45, %v99_v47 }
  0x90   :  { %v94_v52 = vsel %vm93_vm3, %v92_v48, %v90_v50 }
  0x91   :  { %v103_v53 = vsel %vm102_vm4, %v101_v49, %v94_v52 }
  0x92   :  { %v105_v54 = vadd.f32 %v103_v53, %v47_v51 }
  0x94   :  { %107 = vst.msk [vmem:[#allocation2] sm:$0x3] %vm29_vm0, %v105_v54 }
  0x9b   :  { %v111_v55 = vld [vmem:[#allocation2] sm:$0x3] }
  0x9c   :  { %112 = vst.msk [vmem:[#allocation6] sm:$0x3] %vm29_vm0, %v111_v55 }
  0x9d   :  { %123 = dma.vmem_to_hbm [thread:$0]  %s119_s13, 32, %s121_s16, [#allocation5]  }
  0x9e   :  { %185 = dma.done.wait [#allocation5], 32  }
  0x9f   :  { %186 = vsyncadd [#allocation5], 4294967264 }
  0xa0   :  { %128 = vsyncpa [#allocation4], 1 }
  0xa1   :  { %129 = vsyncpa [#allocation5], 1 }

</bundles_post_ra>
